<compile_context>
chip_gen: v7x
topology: tpu7x:2x2x1
jax: 0.10.0
libtpu: 0.0.40
codegen_flags: <defaults>
</compile_context>

<pallas_src>
import functools

import jax
import jax.numpy as jnp
from jax.experimental import pallas as pl
from jax.experimental.pallas import tpu as pltpu

LOG_STD_MIN = -20.0
LOG_STD_MAX = 2.0

_TB_MAX = 1024  # lane-tile cap; per-step work is tiny, fat tiles amortize overhead


def _round_up(n, m):
    return ((n + m - 1) // m) * m


def _cdiv(a, b):
    return -(-a // b)


@functools.lru_cache(maxsize=1)
def _is_v7x():
    try:
        return "v7" in jax.devices()[0].device_kind.lower()
    except Exception:
        return False


def _policy_kernel(x_ref, w1_ref, b1_ref, w2_ref, b2_ref, wh_ref, bh_ref,
                   mean_ref, log_std_ref, *, action_dim):
    x = x_ref[...]                                                    # [S, TB]

    # linear_common_[0] + ReLU   (feature-major: W @ x + b, lanes = batch)
    h1 = jnp.dot(w1_ref[...], x, preferred_element_type=jnp.float32) + b1_ref[...]
    h1 = jnp.maximum(h1, 0.0)                                         # [H, TB]

    # linear_common_[2] + ReLU
    h2 = jnp.dot(w2_ref[...], h1, preferred_element_type=jnp.float32) + b2_ref[...]
    h2 = jnp.maximum(h2, 0.0)                                         # [H, TB]

    # fused mean|log_std head: one [2A, H] x [H, TB] matmul (3 MXU pushes total)
    heads = jnp.dot(wh_ref[...], h2, preferred_element_type=jnp.float32) + bh_ref[...]

    mean_ref[...] = heads[:action_dim, :].astype(mean_ref.dtype)
    log_std_ref[...] = jnp.clip(
        heads[action_dim:2 * action_dim, :], LOG_STD_MIN, LOG_STD_MAX
    ).astype(log_std_ref.dtype)


def pack_params(params):
    """One-time packing of module-style params (w:[in,out], b:[1,out]) into the
    feature-major layout the kernel expects.  Call once, reuse every forward."""
    w1, b1, w2, b2, wm, bm, ws, bs = params
    packed = (
        w1.T,                                              # [H, S]
        b1.reshape(-1, 1),                                 # [H, 1]
        w2.T,                                              # [H, H]
        b2.reshape(-1, 1),                                 # [H, 1]
        jnp.concatenate([wm, ws], axis=1).T,               # [2A, H] (mean rows, then log_std)
        jnp.concatenate([bm, bs], axis=1).reshape(-1, 1),  # [2A, 1]
    )
    return tuple(jnp.asarray(a, jnp.float32) for a in packed)


def gaussian_policy_forward(x, packed_params):
    """x: [B, state_dim] float32; packed_params from pack_params().
    Returns (mean, log_std), each [B, action_dim]."""
    w1, b1, w2, b2, wh, bh = packed_params
    B, state_dim = x.shape
    hidden_dim = w1.shape[0]
    action_dim = wh.shape[0] // 2

    # --- batch tile: multiple of 128 (lanes), sized to avoid padding blow-up ---
    b_pad0 = _round_up(B, 128)
    n_steps = max(1, _cdiv(b_pad0, _TB_MAX))
    if _is_v7x() and b_pad0 >= 256:
        n_steps = max(n_steps, 2)      # make sure both v7x TensorCores run
    tb = _round_up(_cdiv(b_pad0, n_steps), 128)
    b_pad = _round_up(b_pad0, tb)
    grid = (b_pad // tb,)

    # feature-major activations: [state_dim, B_pad]
    x_t = x.T
    if b_pad != B:
        x_t = jnp.pad(x_t, ((0, 0), (0, b_pad - B)))

    x_spec = pl.BlockSpec((state_dim, tb), lambda i: (0, i))
    # Weights/biases: full-array blocks at a constant block index so they stay
    # VMEM-resident across all batch-grid steps.
    const = lambda a: pl.BlockSpec(a.shape, lambda i: (0,) * a.ndim)
    out_spec = pl.BlockSpec((action_dim, tb), lambda i: (0, i))

    flops = 2 * b_pad * (state_dim * hidden_dim + hidden_dim * hidden_dim
                         + hidden_dim * 2 * action_dim)
    bytes_accessed = 4 * (
        state_dim * b_pad
        + hidden_dim * state_dim + hidden_dim
        + hidden_dim * hidden_dim + hidden_dim
        + 2 * action_dim * hidden_dim + 2 * action_dim
        + 2 * action_dim * b_pad
    )
    cost = pl.CostEstimate(flops=flops, transcendentals=0, bytes_accessed=bytes_accessed)

    kernel = functools.partial(_policy_kernel, action_dim=action_dim)

    mean_t, log_std_t = pl.pallas_call(
        kernel,
        out_shape=(jax.ShapeDtypeStruct((action_dim, b_pad), jnp.float32),
                   jax.ShapeDtypeStruct((action_dim, b_pad), jnp.float32)),
        grid=grid,
        in_specs=[x_spec, const(w1), const(b1), const(w2), const(b2),
                  const(wh), const(bh)],
        out_specs=(out_spec, out_spec),
        compiler_params=pltpu.CompilerParams(dimension_semantics=("parallel",)),
        cost_estimate=cost,
    )(x_t, w1, b1, w2, b2, wh, bh)

    mean = mean_t[:, :B].T
    log_std = log_std_t[:, :B].T
    return mean, log_std


def init_params(key, state_dim, action_dim, hidden_dim):
    """Deterministic synthetic module-style params (uniform, fan-in scaling).
    Weights are [in, out], biases [1, out] (same convention as reference)."""
    ks = jax.random.split(key, 8)

    def lin(kw, kb, fan_in, fan_out):
        bound = 1.0 / jnp.sqrt(jnp.float32(fan_in))
        w = jax.random.uniform(kw, (fan_in, fan_out), jnp.float32, -bound, bound)
        b = jax.random.uniform(kb, (1, fan_out), jnp.float32, -bound, bound)
        return w, b

    w1, b1 = lin(ks[0], ks[1], state_dim, hidden_dim)
    w2, b2 = lin(ks[2], ks[3], hidden_dim, hidden_dim)
    wm, bm = lin(ks[4], ks[5], hidden_dim, action_dim)
    ws, bs = lin(ks[6], ks[7], hidden_dim, action_dim)
    return (w1, b1, w2, b2, wm, bm, ws, bs)


def reference_forward(x, params):
    w1, b1, w2, b2, wm, bm, ws, bs = params
    h1 = jnp.maximum(x @ w1 + b1, 0.0)
    h2 = jnp.maximum(h1 @ w2 + b2, 0.0)
    mean = h2 @ wm + bm
    log_std = jnp.clip(h2 @ ws + bs, LOG_STD_MIN, LOG_STD_MAX)
    return mean, log_std


if __name__ == "__main__":
    # Small shapes consistent with the module: state vector input [B, state_dim].
    B, state_dim, action_dim, hidden_dim = 2, 16, 8, 32

    key = jax.random.PRNGKey(0)
    k_x, k_p = jax.random.split(key)
    x = jax.random.normal(k_x, (B, state_dim), dtype=jnp.float32)
    params = init_params(k_p, state_dim, action_dim, hidden_dim)

    # One-time packing (head fusion + transposes) — not part of the per-call path.
    packed = jax.block_until_ready(pack_params(params))

    mean, log_std = gaussian_policy_forward(x, packed)
    mean = jax.block_until_ready(mean)
    log_std = jax.block_until_ready(log_std)

    # Correctness check against a pure-JAX reference.
    ref_mean, ref_log_std = reference_forward(x, params)
    assert mean.shape == (B, action_dim) and log_std.shape == (B, action_dim)
    assert jnp.allclose(mean, ref_mean, atol=1e-5, rtol=1e-5)
    assert jnp.allclose(log_std, ref_log_std, atol=1e-5, rtol=1e-5)

    # TODO(synk): `sample()` (rsample + tanh squash + log_prob) is stochastic
    # distribution glue; the deterministic elementwise part could be fused into
    # the kernel epilogue, but only forward() is implemented here.

    print("KERNEL_OK")
</pallas_src>

<mosaic_0001>
module attributes {stable_mosaic.version = 11 : i64} {
  func.func @_policy_kernel(%arg0: i32, %arg1: memref<16x128xf32, #tpu.memory_space<vmem>>, %arg2: memref<32x16xf32, #tpu.memory_space<vmem>>, %arg3: memref<32x1xf32, #tpu.memory_space<vmem>>, %arg4: memref<32x32xf32, #tpu.memory_space<vmem>>, %arg5: memref<32x1xf32, #tpu.memory_space<vmem>>, %arg6: memref<16x32xf32, #tpu.memory_space<vmem>>, %arg7: memref<16x1xf32, #tpu.memory_space<vmem>>, %arg8: memref<8x128xf32, #tpu.memory_space<vmem>>, %arg9: memref<8x128xf32, #tpu.memory_space<vmem>>) attributes {dimension_semantics = [#tpu.dimension_semantics<parallel>], iteration_bounds = array<i64: 1>, scalar_prefetch = 0 : i64, scratch_operands = 0 : i64, tpu.core_type = #tpu.core_type<tc>, window_params = [{transform_indices = @transform_0, window_bounds = array<i64: 16, 128>}, {pipeline_mode = #tpu.pipeline_mode<synchronous>, transform_indices = @transform_1, window_bounds = array<i64: 32, 16>}, {pipeline_mode = #tpu.pipeline_mode<synchronous>, transform_indices = @transform_2, window_bounds = array<i64: 32, 1>}, {pipeline_mode = #tpu.pipeline_mode<synchronous>, transform_indices = @transform_3, window_bounds = array<i64: 32, 32>}, {pipeline_mode = #tpu.pipeline_mode<synchronous>, transform_indices = @transform_4, window_bounds = array<i64: 32, 1>}, {pipeline_mode = #tpu.pipeline_mode<synchronous>, transform_indices = @transform_5, window_bounds = array<i64: 16, 32>}, {pipeline_mode = #tpu.pipeline_mode<synchronous>, transform_indices = @transform_6, window_bounds = array<i64: 16, 1>}, {transform_indices = @transform_7, window_bounds = array<i64: 8, 128>}, {transform_indices = @transform_8, window_bounds = array<i64: 8, 128>}]} {
    %c0 = arith.constant 0 : index
    %c0_0 = arith.constant 0 : index
    %0 = vector.load %arg1[%c0, %c0_0] : memref<16x128xf32, #tpu.memory_space<vmem>>, vector<16x128xf32>
    %c0_1 = arith.constant 0 : index
    %c0_2 = arith.constant 0 : index
    %1 = vector.load %arg2[%c0_1, %c0_2] : memref<32x16xf32, #tpu.memory_space<vmem>>, vector<32x16xf32>
    %cst = arith.constant dense<0.000000e+00> : vector<32x128xf32>
    %2 = tpu.matmul %1, %0, %cst {dimension_numbers = #tpu.dot_dimension_numbers<[1], [0], [0], [1], [0, 0, 1, 1], [], []>} : vector<32x16xf32>, vector<16x128xf32>, vector<32x128xf32> -> vector<32x128xf32>
    %c0_3 = arith.constant 0 : index
    %c0_4 = arith.constant 0 : index
    %3 = vector.load %arg3[%c0_3, %c0_4] : memref<32x1xf32, #tpu.memory_space<vmem>>, vector<32x1xf32>
    %4 = vector.broadcast %3 : vector<32x1xf32> to vector<32x128xf32>
    %5 = arith.addf %2, %4 : vector<32x128xf32>
    %cst_5 = arith.constant 0.000000e+00 : f32
    %6 = vector.broadcast %cst_5 : f32 to vector<32x128xf32>
    %7 = arith.maximumf %5, %6 : vector<32x128xf32>
    %c0_6 = arith.constant 0 : index
    %c0_7 = arith.constant 0 : index
    %8 = vector.load %arg4[%c0_6, %c0_7] : memref<32x32xf32, #tpu.memory_space<vmem>>, vector<32x32xf32>
    %cst_8 = arith.constant dense<0.000000e+00> : vector<32x128xf32>
    %9 = tpu.matmul %8, %7, %cst_8 {dimension_numbers = #tpu.dot_dimension_numbers<[1], [0], [0], [1], [0, 0, 1, 1], [], []>} : vector<32x32xf32>, vector<32x128xf32>, vector<32x128xf32> -> vector<32x128xf32>
    %c0_9 = arith.constant 0 : index
    %c0_10 = arith.constant 0 : index
    %10 = vector.load %arg5[%c0_9, %c0_10] : memref<32x1xf32, #tpu.memory_space<vmem>>, vector<32x1xf32>
    %11 = vector.broadcast %10 : vector<32x1xf32> to vector<32x128xf32>
    %12 = arith.addf %9, %11 : vector<32x128xf32>
    %cst_11 = arith.constant 0.000000e+00 : f32
    %13 = vector.broadcast %cst_11 : f32 to vector<32x128xf32>
    %14 = arith.maximumf %12, %13 : vector<32x128xf32>
    %c0_12 = arith.constant 0 : index
    %c0_13 = arith.constant 0 : index
    %15 = vector.load %arg6[%c0_12, %c0_13] : memref<16x32xf32, #tpu.memory_space<vmem>>, vector<16x32xf32>
    %cst_14 = arith.constant dense<0.000000e+00> : vector<16x128xf32>
    %16 = tpu.matmul %15, %14, %cst_14 {dimension_numbers = #tpu.dot_dimension_numbers<[1], [0], [0], [1], [0, 0, 1, 1], [], []>} : vector<16x32xf32>, vector<32x128xf32>, vector<16x128xf32> -> vector<16x128xf32>
    %c0_15 = arith.constant 0 : index
    %c0_16 = arith.constant 0 : index
    %17 = vector.load %arg7[%c0_15, %c0_16] : memref<16x1xf32, #tpu.memory_space<vmem>>, vector<16x1xf32>
    %18 = vector.broadcast %17 : vector<16x1xf32> to vector<16x128xf32>
    %19 = arith.addf %16, %18 : vector<16x128xf32>
    %20 = vector.extract_strided_slice %19 {offsets = [0, 0], sizes = [8, 128], strides = [1, 1]} : vector<16x128xf32> to vector<8x128xf32>
    %c0_17 = arith.constant 0 : index
    %c0_18 = arith.constant 0 : index
    %21 = vector.load %arg8[%c0_17, %c0_18] : memref<8x128xf32, #tpu.memory_space<vmem>>, vector<8x128xf32>
    tpu.vector_store %arg8[%c0_17, %c0_18], %20 {strides = array<i32>} : memref<8x128xf32, #tpu.memory_space<vmem>>, vector<8x128xf32>,
    %22 = vector.extract_strided_slice %19 {offsets = [8, 0], sizes = [8, 128], strides = [1, 1]} : vector<16x128xf32> to vector<8x128xf32>
    %cst_19 = arith.constant -2.000000e+01 : f32
    %cst_20 = arith.constant 2.000000e+00 : f32
    %23 = vector.broadcast %cst_19 : f32 to vector<8x128xf32>
    %24 = arith.maximumf %23, %22 : vector<8x128xf32>
    %25 = vector.broadcast %cst_20 : f32 to vector<8x128xf32>
    %26 = arith.minimumf %25, %24 : vector<8x128xf32>
    %c0_21 = arith.constant 0 : index
    %c0_22 = arith.constant 0 : index
    %27 = vector.load %arg9[%c0_21, %c0_22] : memref<8x128xf32, #tpu.memory_space<vmem>>, vector<8x128xf32>
    tpu.vector_store %arg9[%c0_21, %c0_22], %26 {strides = array<i32>} : memref<8x128xf32, #tpu.memory_space<vmem>>, vector<8x128xf32>,
    return
  }
  func.func @transform_0(%arg0: i32) -> (i32, i32) {
    %c0_i32 = arith.constant 0 : i32
    %c0_i32_0 = arith.constant 0 : i32
    return %c0_i32, %arg0 : i32, i32
  }
  func.func @transform_1(%arg0: i32) -> (i32, i32) {
    %c0_i32 = arith.constant 0 : i32
    %c0_i32_0 = arith.constant 0 : i32
    %c0_i32_1 = arith.constant 0 : i32
    return %c0_i32, %c0_i32_0 : i32, i32
  }
  func.func @transform_2(%arg0: i32) -> (i32, i32) {
    %c0_i32 = arith.constant 0 : i32
    %c0_i32_0 = arith.constant 0 : i32
    %c0_i32_1 = arith.constant 0 : i32
    return %c0_i32, %c0_i32_0 : i32, i32
  }
  func.func @transform_3(%arg0: i32) -> (i32, i32) {
    %c0_i32 = arith.constant 0 : i32
    %c0_i32_0 = arith.constant 0 : i32
    %c0_i32_1 = arith.constant 0 : i32
    return %c0_i32, %c0_i32_0 : i32, i32
  }
  func.func @transform_4(%arg0: i32) -> (i32, i32) {
    %c0_i32 = arith.constant 0 : i32
    %c0_i32_0 = arith.constant 0 : i32
    %c0_i32_1 = arith.constant 0 : i32
    return %c0_i32, %c0_i32_0 : i32, i32
  }
  func.func @transform_5(%arg0: i32) -> (i32, i32) {
    %c0_i32 = arith.constant 0 : i32
    %c0_i32_0 = arith.constant 0 : i32
    %c0_i32_1 = arith.constant 0 : i32
    return %c0_i32, %c0_i32_0 : i32, i32
  }
  func.func @transform_6(%arg0: i32) -> (i32, i32) {
    %c0_i32 = arith.constant 0 : i32
    %c0_i32_0 = arith.constant 0 : i32
    %c0_i32_1 = arith.constant 0 : i32
    return %c0_i32, %c0_i32_0 : i32, i32
  }
  func.func @transform_7(%arg0: i32) -> (i32, i32) {
    %c0_i32 = arith.constant 0 : i32
    %c0_i32_0 = arith.constant 0 : i32
    return %c0_i32, %arg0 : i32, i32
  }
  func.func @transform_8(%arg0: i32) -> (i32, i32) {
    %c0_i32 = arith.constant 0 : i32
    %c0_i32_0 = arith.constant 0 : i32
    return %c0_i32, %arg0 : i32, i32
  }
}

</mosaic_0001>

<bundles_post_ra>
// kernel: tpu_custom_call.1
= control target key start
LH: loop header
LB: loop body
LE: loop exit
PB: predicated region body
PF: predicated region fallthrough
CT: control target
= control target key end

     0   :  { %14 = vsyncpa [#allocation3], 0  ;;  %vm60_vm0 = vcmask 130048   ;;  %v557_v4 = vmov 0   ;;  %s705_s0 = inlined_call_operand.vmem [shape: f32[16,128], index: 0, kind: input, shape index: {}]   ;;  %s706_s1 = inlined_call_operand.vmem [shape: f32[32,16], index: 1, kind: input, shape index: {}]   ;;  %s707_s2 = inlined_call_operand.vmem [shape: f32[32,1], index: 2, kind: input, shape index: {}]   ;;  %s708_s3 = inlined_call_operand.vmem [shape: f32[32,32], index: 3, kind: input, shape index: {}]   ;;  %s709_s4 = inlined_call_operand.vmem [shape: f32[32,1], index: 4, kind: input, shape index: {}]   ;;  %s710_s5 = inlined_call_operand.vmem [shape: f32[16,32], index: 5, kind: input, shape index: {}]   ;;  %s711_s6 = inlined_call_operand.vmem [shape: f32[16,1], index: 6, kind: input, shape index: {}]   ;;  %s712_s7 = inlined_call_operand.hbm [shape: f32[8,128], index: 7, kind: output, shape index: {0}]   ;;  %s713_s8 = inlined_call_operand.hbm [shape: f32[8,128], index: 8, kind: output, shape index: {1}]  }
   0x1   :  { %v30_v0 = vld [vmem:[%s705_s0] sm:$0xff]  ;;  %v31_v1 = vld [vmem:[%s705_s0 + $0x8] sm:$0xff]  ;;  %507 = vset.pattern.permute.xlu0 %v557_v4  ;;  %508 = vset.pattern.permute.xlu1 %v557_v4  ;;  %v38_v6 = vld [vmem:[%s707_s2 + $0x10] sm:$0xff] }
   0x2   :  { %v32_v2 = vld [vmem:[%s706_s1] sm:$0xff]  ;;  %v484_v3 = vpack.c.bf16 %v31_v1, %v30_v0  ;;  %v33_v7 = vld [vmem:[%s706_s1 + $0x8] sm:$0xff]  ;;  %52 = vperm.xlu1 %508, %v38_v6   ;;  %v34_v9 = vld [vmem:[%s706_s1 + $0x10] sm:$0xff] }
   0x3   :  { %453 = vmatprep.mubr.msk.f32.mxu0 %vm60_vm0, %v32_v2  ;;  %v36_v5 = vld [vmem:[%s707_s2] sm:$0xff]  ;;  %v37_v8 = vld [vmem:[%s707_s2 + $0x8] sm:$0xff]  ;;  %v39_v10 = vld [vmem:[%s707_s2 + $0x18] sm:$0xff] }
   0x4   :  { %485 = vmatprep.subr.bf16.mxu0 %v484_v3  ;;  %42 = vperm.xlu0 %507, %v36_v5  }
   0x5   :  { %487 = vmatpush3.bf16.msra.mxu0 %v484_v3 }
   0x6   :  { %15 = vsyncpa [#allocation5], 0  ;;  %v35_v11 = vld [vmem:[%s706_s1 + $0x18] sm:$0xff]  ;;  %57 = vperm.xlu1 %508, %v39_v10   ;;  %v166_v12 = vld [vmem:[%s709_s4] sm:$0xff]  ;;  %vm190_vm1 = vcmask 261120   ;;  %s558_s20 = smov [#allocation2]  }
   0x7   :  { %v167_v13 = vld [vmem:[%s709_s4 + $0x8] sm:$0xff]  ;;  %v168_v14 = vld [vmem:[%s709_s4 + $0x10] sm:$0xff]  ;;  %v169_v15 = vld [vmem:[%s709_s4 + $0x18] sm:$0xff]  ;;  %s397_s21 = sshll.u32 %s558_s20, 4  ;;  %s559_s22 = smov [#allocation4]   ;;  %s398_s21 = int_to_ptr.vmem [resolvable:$true] %s397_s21 }
   0x8   :  { %454 = vmatmul.mubr.msk.f32.vlgmr.msra.gmra.mrb[0].mxu0 %vm60_vm0, %v33_v7  ;;  %47 = vperm.xlu0 %507, %v37_v8   ;;  %v295_v16 = vld [vmem:[%s711_s6 + $0x8] sm:$0xff]  ;;  %v294_v17 = vld [vmem:[%s711_s6] sm:$0xff]  ;;  %v164_v38 = vld [vmem:[%s708_s3 + $0x10] sm:$0xff]  ;;  %s407_s23 = sshll.u32 %s559_s22, 4  ;;  %s509_s24 = scalar_lea.vmem %s398_s21, 128  ;;  %s408_s23 = int_to_ptr.vmem [resolvable:$true] %s407_s23 }
   0x9   :  { %456 = vmatprep.mubr.msk.f32.mxu0 %vm60_vm0, %v34_v9  ;;  %v162_v18 = vld [vmem:[%s708_s3] sm:$0xff]  ;;  %v163_v37 = vld [vmem:[%s708_s3 + $0x8] sm:$0xff]  ;;  %v165_v39 = vld [vmem:[%s708_s3 + $0x18] sm:$0xff]  ;;  %p510_p0 = scmp.ne.s32.totalorder %s398_s21, %s509_s24  ;;  %p514_p1 = scmp.lt.s32.totalorder %s398_s21, %s398_s21 }
   0xa   :  { %177 = vperm.xlu1 %508, %v167_v13   ;;  %467 = vmatprep.mubr.msk.f32.mxu1 %vm190_vm1, %v162_v18  ;;  %v292_v40 = vld [vmem:[%s710_s5] sm:$0xff]  ;;  %v293_v59 = vld [vmem:[%s710_s5 + $0x8] sm:$0xff]  ;;  %p515_p2 = scmp.lt.s32.totalorder %s509_s24, %s509_s24 }
   0xc   :  { %457 = vmatmul.mubr.msk.f32.gmra.mrb[2].mxu0 %vm60_vm0, %v35_v11  ;;  %172 = vperm.xlu0 %507, %v166_v12   ;;  %p516_p3 = por %p515_p2, %p514_p1 }
   0xd   :  { %481 = vmatprep.mubr.msk.f32.mxu0 %vm190_vm1, %v292_v40 }
   0xe   :  { %187 = vperm.xlu1 %508, %v169_v15   ;;  %p517_p4 = pnand %p516_p3, %p510_p0 }
  0x10   :  { %182 = vperm.xlu0 %507, %v168_v14  }
  0x12   :  { %298 = vperm.xlu1 %508, %v294_v17  }
  0x14   :  { %303 = vperm.xlu0 %507, %v295_v16  }
  0x81   :  { %v53_v20 = vpop.permute.xlu1 %52 }
  0x83   :  { %v43_v19 = vpop.permute.xlu0 %42 }
  0x85   :  { %v58_v27 = vpop.permute.xlu1 %57 }
  0x87   :  { %v48_v21 = vpop.permute.xlu0 %47 }
  0x89   :  { %v178_v41 = vpop.permute.xlu1 %177 }
  0x8b   :  { %v173_v42 = vpop.permute.xlu0 %172 }
  0x8d   :  { %v188_v48 = vpop.permute.xlu1 %187 }
  0x8f   :  { %v183_v51 = vpop.permute.xlu0 %182 }
  0x91   :  { %v299_v62 = vpop.permute.xlu1 %298 }
  0x93   :  { %v304_v60 = vpop.permute.xlu0 %303 }
  0xdb   :  { %v455_v22 = vpop.f32.mrb[0].mxu0 }
  0xdc   :  { %v145_v23 = vadd.f32 %v455_v22, %v48_v21  ;;  %v139_v24 = vpop.f32.mrb[1].mxu0 }
  0xdd   :  { %v140_v25 = vadd.f32 %v139_v24, %v43_v19 }
  0xde   :  { %v159_v26 = vmax.f32 %v145_v23, 0.0 }
  0xdf   :  { %v158_v28 = vmax.f32 %v140_v25, 0.0  ;;  %v458_v29 = vpop.f32.mrb[2].mxu0 }
  0xe0   :  { %v155_v30 = vadd.f32 %v458_v29, %v58_v27  ;;  %v149_v31 = vpop.f32.mrb[3].mxu0 }
  0xe1   :  { %v150_v32 = vadd.f32 %v149_v31, %v53_v20  ;;  %v488_v33 = vpack.c.bf16 %v159_v26, %v158_v28 }
  0xe2   :  { %v161_v34 = vmax.f32 %v155_v30, 0.0 }
  0xe3   :  { %v160_v35 = vmax.f32 %v150_v32, 0.0  ;;  %489 = vmatprep.subr.bf16.mxu1 %v488_v33 }
  0xe4   :  { %491 = vmatpush3.bf16.msra.mxu1 %v488_v33 }
  0xe5   :  { %v492_v36 = vpack.c.bf16 %v161_v34, %v160_v35 }
  0xe7   :  { %493 = vmatprep.subr.bf16.mxu1 %v492_v36 }
  0xe8   :  { %495 = vmatpush3.bf16.msra.mxu1 %v492_v36 }
  0xeb   :  { %468 = vmatmul.mubr.msk.f32.vlgmr.msra.gmra.mrb[0].mxu1 %vm190_vm1, %v163_v37 }
  0xec   :  { %470 = vmatprep.mubr.msk.f32.mxu1 %vm190_vm1, %v164_v38 }
  0xef   :  { %471 = vmatmul.mubr.msk.f32.gmra.mrb[2].mxu1 %vm190_vm1, %v165_v39 }
 0x1be   :  { %v469_v43 = vpop.f32.mrb[0].mxu1 }
 0x1bf   :  { %v275_v44 = vadd.f32 %v469_v43, %v178_v41  ;;  %v269_v45 = vpop.f32.mrb[1].mxu1 }
 0x1c0   :  { %v270_v46 = vadd.f32 %v269_v45, %v173_v42 }
 0x1c1   :  { %v289_v47 = vmax.f32 %v275_v44, 0.0 }
 0x1c2   :  { %v288_v49 = vmax.f32 %v270_v46, 0.0  ;;  %v472_v50 = vpop.f32.mrb[2].mxu1 }
 0x1c3   :  { %v285_v52 = vadd.f32 %v472_v50, %v188_v48  ;;  %v279_v53 = vpop.f32.mrb[3].mxu1 }
 0x1c4   :  { %v496_v54 = vpack.c.bf16 %v289_v47, %v288_v49  ;;  %v280_v55 = vadd.f32 %v279_v53, %v183_v51 }
 0x1c5   :  { %v291_v56 = vmax.f32 %v285_v52, 0.0 }
 0x1c6   :  { %v290_v57 = vmax.f32 %v280_v55, 0.0  ;;  %497 = vmatprep.subr.bf16.mxu0 %v496_v54 }
 0x1c7   :  { %499 = vmatpush3.bf16.msra.mxu0 %v496_v54 }
 0x1c8   :  { %v500_v58 = vpack.c.bf16 %v291_v56, %v290_v57 }
 0x1ca   :  { %501 = vmatprep.subr.bf16.mxu0 %v500_v58 }
 0x1cb   :  { %503 = vmatpush3.bf16.msra.mxu0 %v500_v58 }
 0x1ce   :  { %482 = vmatmul.mubr.msk.f32.vlgmr.msra.gmra.mrb[4].mxu0 %vm190_vm1, %v293_v59 }
 0x2a1   :  { %v483_v61 = vpop.f32.mrb[4].mxu0 }
 0x2a2   :  { %v384_v63 = vadd.f32 %v483_v61, %v304_v60  ;;  %v378_v0 = vpop.f32.mrb[5].mxu0 }
 0x2a3   :  { %v379_v1 = vadd.f32 %v378_v0, %v299_v62 }
 0x2a4   :  { %v388_v2 = vmax.f32 %v384_v63, -20.0 }
 0x2a5   :  { %387 = vst [vmem:[#allocation2] sm:$0xff] %v379_v1 }
 0x2a6   :  { %v389_v3 = vmin.f32 %v388_v2, 2.0 }
 0x2a7   :  { %520 = shalt.err (!%p517_p4)
}
 0x2a8   :  { %s521_s26 = scalar_lea.hbm %s712_s7, 128 }
 0x2a9   :  { %p522_p5 = scmp.ne.s32.totalorder %s712_s7, %s521_s26  ;;  %p525_p6 = scmp.lt.u32.totalorder %s521_s26, %s712_s7 }
 0x2ab   :  { %p527_p7 = pnand %p525_p6, %p522_p5 }
 0x2ad   :  { %530 = shalt.err (!%p527_p7)
}
 0x2ae   :  { %400 = dma.vmem_to_hbm [thread:$0]  %s398_s21, 128, %s712_s7, [#allocation3]   ;;  %390 = vst [vmem:[#allocation4] sm:$0xff] %v389_v3 }
 0x2af   :  { %s531_s9 = scalar_lea.vmem %s408_s23, 128  ;;  %p536_p9 = scmp.lt.s32.totalorder %s408_s23, %s408_s23 }
 0x2b0   :  { %p532_p8 = scmp.ne.s32.totalorder %s408_s23, %s531_s9  ;;  %p537_p10 = scmp.lt.s32.totalorder %s531_s9, %s531_s9 }
 0x2b2   :  { %p538_p11 = por %p537_p10, %p536_p9 }
 0x2b4   :  { %p539_p12 = pnand %p538_p11, %p532_p8 }
 0x2b6   :  { %542 = shalt.err (!%p539_p12)
}
 0x2b7   :  { %s543_s12 = scalar_lea.hbm %s713_s8, 128 }
 0x2b8   :  { %p544_p13 = scmp.ne.s32.totalorder %s713_s8, %s543_s12  ;;  %p547_p0 = scmp.lt.u32.totalorder %s543_s12, %s713_s8 }
 0x2ba   :  { %p549_p1 = pnand %p547_p0, %p544_p13 }
 0x2bc   :  { %552 = shalt.err (!%p549_p1)
}
 0x2bd   :  { %410 = dma.vmem_to_hbm [thread:$0]  %s408_s23, 128, %s713_s8, [#allocation5]  }
 0x2be   :  { %553 = dma.done.wait [#allocation3], 128  }
 0x2bf   :  { %554 = vsyncadd [#allocation3], 4294967168 }
 0x2c0   :  { %555 = dma.done.wait [#allocation5], 128  }
 0x2c1   :  { %556 = vsyncadd [#allocation5], 4294967168 }
 0x2c2   :  { %417 = vsyncpa [#allocation3], 1 }
 0x2c3   :  { %418 = vsyncpa [#allocation5], 1 }

</bundles_post_ra>
